<compile_context>
chip_gen: v7x
topology: tpu7x:2x2x1
jax: 0.10.0
libtpu: 0.0.40
codegen_flags: <defaults>
</compile_context>

<pallas_src>
import functools

import jax
import jax.numpy as jnp
import numpy as np
from jax.experimental import pallas as pl
from jax.experimental.pallas import tpu as pltpu


_VMEM_LIMIT_BYTES = 32 * 1024 * 1024  # safe on v5e/v6e/v7x, above all defaults


# ---------------------------------------------------------------------------
# Kernels
# ---------------------------------------------------------------------------
def scse_fused_kernel(x_ref, w1t_ref, w2_ref, cw_ref, cb_ref, o_ref, *, inv_hw):
    """One batch element, whole (C, HW) slab resident. x read once."""
    x = x_ref[0]                                                    # (C, HW)

    # --- cSE: global avg-pool over HW (lane reduction) -> tiny MLP (column form)
    pooled = jnp.sum(x.astype(jnp.float32), axis=1, keepdims=True) * inv_hw   # (C, 1)
    h = jnp.maximum(jnp.sum(pooled * w1t_ref[...], axis=0, keepdims=True), 0.0)   # (1, Cr)
    yc = jax.nn.sigmoid(jnp.sum(w2_ref[...] * h, axis=1, keepdims=True))          # (C, 1)

    # --- sSE: 1x1 conv (C -> 1) as an MXU dot, bias from SMEM
    s = jax.nn.sigmoid(
        jnp.dot(cw_ref[...], x, preferred_element_type=jnp.float32)
        + cb_ref[0, 0])                                             # (1, HW)

    # --- fused combine: x*yc + x*s == x*(yc + s)
    o_ref[0] = (x * (yc + s)).astype(o_ref.dtype)


def cse_pool_kernel(x_ref, w1t_ref, w2_ref, yc_ref, acc_ref, *,
                    inv_hw, hw_total, needs_mask):
    """Tiled path, pass 1: accumulate the spatial sum, run the tiny MLP at the end."""
    t = pl.program_id(1)

    @pl.when(t == 0)
    def _init():
        acc_ref[...] = jnp.zeros_like(acc_ref)

    x = x_ref[0].astype(jnp.float32)                                # (C, hw_tile)
    if needs_mask:  # boundary tile may overrun HW; mask padded lanes out of the sum
        col = jax.lax.broadcasted_iota(jnp.int32, x.shape, 1) + t * x.shape[1]
        x = jnp.where(col < hw_total, x, 0.0)
    acc_ref[...] += jnp.sum(x, axis=1, keepdims=True)               # (C, 1)

    @pl.when(t == pl.num_programs(1) - 1)
    def _finalize():
        pooled = acc_ref[...] * inv_hw                              # (C, 1)
        h = jnp.maximum(jnp.sum(pooled * w1t_ref[...], axis=0, keepdims=True), 0.0)
        yc_ref[0] = jax.nn.sigmoid(jnp.sum(w2_ref[...] * h, axis=1, keepdims=True))


def scse_apply_kernel(x_ref, yc_ref, cw_ref, cb_ref, o_ref):
    """Tiled path, pass 2: streaming per-(batch, HW-tile) sSE + fused combine."""
    x = x_ref[0]                                                    # (C, hw_tile)
    s = jax.nn.sigmoid(
        jnp.dot(cw_ref[...], x, preferred_element_type=jnp.float32)
        + cb_ref[0, 0])                                             # (1, hw_tile)
    o_ref[0] = (x * (yc_ref[0] + s)).astype(o_ref.dtype)


# ---------------------------------------------------------------------------
# Wrapper
# ---------------------------------------------------------------------------
def scse_pallas(x_nchw, w1, w2, conv_w, conv_b, *,
                fused_block_bytes=4 * 1024 * 1024,
                tile_target_bytes=2 * 1024 * 1024):
    N, C, H, W = x_nchw.shape
    HW = H * W
    Cr = w1.shape[0]
    dtype = x_nchw.dtype
    elem = jnp.dtype(dtype).itemsize

    x = x_nchw.reshape(N, C, HW)                    # free view, NCHW kept (no transpose)
    w1t = jnp.asarray(w1).T.astype(jnp.float32)     # (C, Cr)
    w2m = jnp.asarray(w2).astype(jnp.float32)       # (C, Cr)
    cw = conv_w.reshape(1, C).astype(dtype)         # 1x1 conv weight as a row vector
    cb = conv_b.reshape(1, 1).astype(jnp.float32)   # scalar bias -> SMEM

    block_bytes = C * HW * elem

    if block_bytes <= fused_block_bytes:
        # ----- fused single-pass path: x read from HBM exactly once -----
        out = pl.pallas_call(
            functools.partial(scse_fused_kernel, inv_hw=1.0 / HW),
            out_shape=jax.ShapeDtypeStruct((N, C, HW), dtype),
            grid_spec=pltpu.PrefetchScalarGridSpec(
                num_scalar_prefetch=0,
                grid=(N,),
                in_specs=[
                    pl.BlockSpec((1, C, HW), lambda n: (n, 0, 0)),        # x
                    pl.BlockSpec((C, Cr), lambda n: (0, 0)),              # W1^T
                    pl.BlockSpec((C, Cr), lambda n: (0, 0)),              # W2
                    pl.BlockSpec((1, C), lambda n: (0, 0)),               # conv weight
                    pl.BlockSpec(memory_space=pltpu.MemorySpace.SMEM),    # conv bias
                ],
                out_specs=pl.BlockSpec((1, C, HW), lambda n: (n, 0, 0)),
            ),
            compiler_params=pltpu.CompilerParams(
                dimension_semantics=("parallel",),
                vmem_limit_bytes=_VMEM_LIMIT_BYTES),
        )(x, w1t, w2m, cw, cb)
        return out.reshape(N, C, H, W)

    # ----- tiled two-pass path for large spatial extents -----
    hw_tile = max(128, (tile_target_bytes // (C * elem)) // 128 * 128)
    hw_tile = min(hw_tile, HW)
    num_t = (HW + hw_tile - 1) // hw_tile
    needs_mask = (HW % hw_tile) != 0

    # pass 1: global average pool + tiny MLP -> yc (N, C, 1)
    yc = pl.pallas_call(
        functools.partial(cse_pool_kernel, inv_hw=1.0 / HW,
                          hw_total=HW, needs_mask=needs_mask),
        out_shape=jax.ShapeDtypeStruct((N, C, 1), jnp.float32),
        grid_spec=pltpu.PrefetchScalarGridSpec(
            num_scalar_prefetch=0,
            grid=(N, num_t),
            in_specs=[
                pl.BlockSpec((1, C, hw_tile), lambda n, t: (n, 0, t)),
                pl.BlockSpec((C, Cr), lambda n, t: (0, 0)),
                pl.BlockSpec((C, Cr), lambda n, t: (0, 0)),
            ],
            out_specs=pl.BlockSpec((1, C, 1), lambda n, t: (n, 0, 0)),
            scratch_shapes=[pltpu.VMEM((C, 1), jnp.float32)],
        ),
        compiler_params=pltpu.CompilerParams(
            dimension_semantics=("parallel", "arbitrary"),
            vmem_limit_bytes=_VMEM_LIMIT_BYTES),
    )(x, w1t, w2m)

    # pass 2: streaming sSE + combine, fully parallel (shards across v7x's 2 TCs)
    out = pl.pallas_call(
        scse_apply_kernel,
        out_shape=jax.ShapeDtypeStruct((N, C, HW), dtype),
        grid_spec=pltpu.PrefetchScalarGridSpec(
            num_scalar_prefetch=0,
            grid=(N, num_t),
            in_specs=[
                pl.BlockSpec((1, C, hw_tile), lambda n, t: (n, 0, t)),    # x
                pl.BlockSpec((1, C, 1), lambda n, t: (n, 0, 0)),          # yc
                pl.BlockSpec((1, C), lambda n, t: (0, 0)),                # conv weight
                pl.BlockSpec(memory_space=pltpu.MemorySpace.SMEM),        # conv bias
            ],
            out_specs=pl.BlockSpec((1, C, hw_tile), lambda n, t: (n, 0, t)),
        ),
        compiler_params=pltpu.CompilerParams(
            dimension_semantics=("parallel", "parallel"),
            vmem_limit_bytes=_VMEM_LIMIT_BYTES),
    )(x, yc, cw, cb)
    return out.reshape(N, C, H, W)


# ---------------------------------------------------------------------------
# Pure-JAX reference (mirrors the PyTorch semantics)
# ---------------------------------------------------------------------------
def scse_reference(x, w1, w2, conv_w, conv_b):
    N, C, H, W = x.shape
    pooled = jnp.mean(x, axis=(2, 3))                   # (N, C)
    h = jnp.maximum(pooled @ w1.T, 0.0)                 # (N, C//r)
    yc = jax.nn.sigmoid(h @ w2.T)                       # (N, C)
    cse = x * yc[:, :, None, None]
    s = jax.nn.sigmoid(
        jnp.einsum('nchw,c->nhw', x, conv_w.reshape(C)) + conv_b.reshape(()))
    sse = x * s[:, None, :, :]
    return cse + sse


if __name__ == "__main__":
    # shapes consistent with the module: SCSE(in_ch=32, r=4)
    N, C, H, W = 2, 32, 16, 16
    r = 4
    Cr = C // r

    key = jax.random.PRNGKey(0)
    kx, k1, k2, k3, k4 = jax.random.split(key, 5)
    x = jax.random.normal(kx, (N, C, H, W), dtype=jnp.float32)

    # deterministic parameter init (shapes follow the module __init__)
    w1 = jax.random.normal(k1, (Cr, C), dtype=jnp.float32) / np.sqrt(C)     # Linear(C, C//r, bias=False)
    w2 = jax.random.normal(k2, (C, Cr), dtype=jnp.float32) / np.sqrt(Cr)    # Linear(C//r, C, bias=False)
    conv_w = jax.random.normal(k3, (1, C, 1, 1), dtype=jnp.float32) / np.sqrt(C)  # Conv2d(C, 1, 1)
    conv_b = jax.random.normal(k4, (1,), dtype=jnp.float32)

    ref = scse_reference(x, w1, w2, conv_w, conv_b)

    # fused single-kernel path (default budgets; the whole (C, HW) slab fits VMEM)
    out_fused = jax.block_until_ready(scse_pallas(x, w1, w2, conv_w, conv_b))
    np.testing.assert_allclose(np.asarray(out_fused), np.asarray(ref),
                               rtol=1e-5, atol=1e-5)

    # tiled two-kernel path (force small budgets so it is exercised at test shape)
    out_tiled = jax.block_until_ready(
        scse_pallas(x, w1, w2, conv_w, conv_b,
                    fused_block_bytes=0, tile_target_bytes=128 * C * 4))
    np.testing.assert_allclose(np.asarray(out_tiled), np.asarray(ref),
                               rtol=1e-5, atol=1e-5)

    print("KERNEL_OK")
</pallas_src>

<mosaic_0001>
module attributes {stable_mosaic.version = 11 : i64} {
  func.func @scse_fused_kernel(%arg0: i32, %arg1: memref<1x32x256xf32, #tpu.memory_space<vmem>>, %arg2: memref<32x8xf32, #tpu.memory_space<vmem>>, %arg3: memref<32x8xf32, #tpu.memory_space<vmem>>, %arg4: memref<1x32xf32, #tpu.memory_space<vmem>>, %arg5: memref<1x1xf32, #tpu.memory_space<smem>>, %arg6: memref<1x32x256xf32, #tpu.memory_space<vmem>>) attributes {dimension_semantics = [#tpu.dimension_semantics<parallel>], iteration_bounds = array<i64: 2>, scalar_prefetch = 0 : i64, scratch_operands = 0 : i64, tpu.core_type = #tpu.core_type<tc>, window_params = [{transform_indices = @transform_0, window_bounds = array<i64: 1, 32, 256>}, {pipeline_mode = #tpu.pipeline_mode<synchronous>, transform_indices = @transform_1, window_bounds = array<i64: 32, 8>}, {pipeline_mode = #tpu.pipeline_mode<synchronous>, transform_indices = @transform_2, window_bounds = array<i64: 32, 8>}, {pipeline_mode = #tpu.pipeline_mode<synchronous>, transform_indices = @transform_3, window_bounds = array<i64: 1, 32>}, {transform_indices = @transform_4, window_bounds = array<i64: 1, 1>}, {transform_indices = @transform_5, window_bounds = array<i64: 1, 32, 256>}]} {
    %c0 = arith.constant 0 : index
    %c0_0 = arith.constant 0 : index
    %c0_1 = arith.constant 0 : index
    %0 = vector.load %arg1[%c0, %c0_0, %c0_1] : memref<1x32x256xf32, #tpu.memory_space<vmem>>, vector<1x32x256xf32>
    %1 = vector.shape_cast %0 : vector<1x32x256xf32> to vector<32x256xf32>
    %cst = arith.constant dense<0.000000e+00> : vector<32xf32>
    %2 = vector.multi_reduction <add>, %1, %cst [1] : vector<32x256xf32> to vector<32xf32>
    %3 = vector.shape_cast %2 : vector<32xf32> to vector<32x1xf32>
    %cst_2 = arith.constant 3.906250e-03 : f32
    %4 = vector.broadcast %cst_2 : f32 to vector<32x1xf32>
    %5 = arith.mulf %3, %4 : vector<32x1xf32>
    %c0_3 = arith.constant 0 : index
    %c0_4 = arith.constant 0 : index
    %6 = vector.load %arg2[%c0_3, %c0_4] : memref<32x8xf32, #tpu.memory_space<vmem>>, vector<32x8xf32>
    %7 = vector.broadcast %5 : vector<32x1xf32> to vector<32x8xf32>
    %8 = arith.mulf %7, %6 : vector<32x8xf32>
    %cst_5 = arith.constant dense<0.000000e+00> : vector<8xf32>
    %9 = vector.multi_reduction <add>, %8, %cst_5 [0] : vector<32x8xf32> to vector<8xf32>
    %10 = vector.shape_cast %9 : vector<8xf32> to vector<1x8xf32>
    %cst_6 = arith.constant 0.000000e+00 : f32
    %11 = vector.broadcast %cst_6 : f32 to vector<1x8xf32>
    %12 = arith.maximumf %10, %11 : vector<1x8xf32>
    %c0_7 = arith.constant 0 : index
    %c0_8 = arith.constant 0 : index
    %13 = vector.load %arg3[%c0_7, %c0_8] : memref<32x8xf32, #tpu.memory_space<vmem>>, vector<32x8xf32>
    %14 = vector.broadcast %12 : vector<1x8xf32> to vector<32x8xf32>
    %15 = arith.mulf %13, %14 : vector<32x8xf32>
    %cst_9 = arith.constant dense<0.000000e+00> : vector<32xf32>
    %16 = vector.multi_reduction <add>, %15, %cst_9 [1] : vector<32x8xf32> to vector<32xf32>
    %17 = vector.shape_cast %16 : vector<32xf32> to vector<32x1xf32>
    %18 = arith.negf %17 : vector<32x1xf32>
    %19 = math.exp %18 : vector<32x1xf32>
    %cst_10 = arith.constant 1.000000e+00 : f32
    %20 = vector.broadcast %cst_10 : f32 to vector<32x1xf32>
    %21 = arith.addf %20, %19 : vector<32x1xf32>
    %22 = arith.divf %20, %21 : vector<32x1xf32>
    %c0_11 = arith.constant 0 : index
    %c0_12 = arith.constant 0 : index
    %23 = vector.load %arg4[%c0_11, %c0_12] : memref<1x32xf32, #tpu.memory_space<vmem>>, vector<1x32xf32>
    %cst_13 = arith.constant dense<0.000000e+00> : vector<1x256xf32>
    %24 = tpu.matmul %23, %1, %cst_13 {dimension_numbers = #tpu.dot_dimension_numbers<[1], [0], [0], [1], [0, 0, 1, 1], [], []>} : vector<1x32xf32>, vector<32x256xf32>, vector<1x256xf32> -> vector<1x256xf32>
    %c0_14 = arith.constant 0 : index
    %c0_15 = arith.constant 0 : index
    %25 = memref.load %arg5[%c0_14, %c0_15] : memref<1x1xf32, #tpu.memory_space<smem>>
    %26 = vector.broadcast %25 : f32 to vector<1x256xf32>
    %27 = arith.addf %24, %26 : vector<1x256xf32>
    %28 = arith.negf %27 : vector<1x256xf32>
    %29 = math.exp %28 : vector<1x256xf32>
    %cst_16 = arith.constant 1.000000e+00 : f32
    %30 = vector.broadcast %cst_16 : f32 to vector<1x256xf32>
    %31 = arith.addf %30, %29 : vector<1x256xf32>
    %32 = arith.divf %30, %31 : vector<1x256xf32>
    %33 = vector.broadcast %22 : vector<32x1xf32> to vector<32x256xf32>
    %34 = vector.broadcast %32 : vector<1x256xf32> to vector<32x256xf32>
    %35 = arith.addf %33, %34 : vector<32x256xf32>
    %36 = arith.mulf %1, %35 : vector<32x256xf32>
    %c0_17 = arith.constant 0 : index
    %c0_18 = arith.constant 0 : index
    %c0_19 = arith.constant 0 : index
    %37 = vector.load %arg6[%c0_17, %c0_18, %c0_19] : memref<1x32x256xf32, #tpu.memory_space<vmem>>, vector<1x32x256xf32>
    %38 = vector.shape_cast %37 : vector<1x32x256xf32> to vector<32x256xf32>
    %39 = vector.shape_cast %36 : vector<32x256xf32> to vector<1x32x256xf32>
    tpu.vector_store %arg6[%c0_17, %c0_18, %c0_19], %39 {strides = array<i32>} : memref<1x32x256xf32, #tpu.memory_space<vmem>>, vector<1x32x256xf32>,
    return
  }
  func.func @transform_0(%arg0: i32) -> (i32, i32, i32) {
    %c0_i32 = arith.constant 0 : i32
    %c0_i32_0 = arith.constant 0 : i32
    %c0_i32_1 = arith.constant 0 : i32
    return %arg0, %c0_i32, %c0_i32_0 : i32, i32, i32
  }
  func.func @transform_1(%arg0: i32) -> (i32, i32) {
    %c0_i32 = arith.constant 0 : i32
    %c0_i32_0 = arith.constant 0 : i32
    %c0_i32_1 = arith.constant 0 : i32
    return %c0_i32, %c0_i32_0 : i32, i32
  }
  func.func @transform_2(%arg0: i32) -> (i32, i32) {
    %c0_i32 = arith.constant 0 : i32
    %c0_i32_0 = arith.constant 0 : i32
    %c0_i32_1 = arith.constant 0 : i32
    return %c0_i32, %c0_i32_0 : i32, i32
  }
  func.func @transform_3(%arg0: i32) -> (i32, i32) {
    %c0_i32 = arith.constant 0 : i32
    %c0_i32_0 = arith.constant 0 : i32
    %c0_i32_1 = arith.constant 0 : i32
    return %c0_i32, %c0_i32_0 : i32, i32
  }
  func.func @transform_4(%arg0: i32) -> (i32, i32) {
    %c0_i32 = arith.constant 0 : i32
    %c0_i32_0 = arith.constant 0 : i32
    %c0_i32_1 = arith.constant 0 : i32
    return %c0_i32, %c0_i32_0 : i32, i32
  }
  func.func @transform_5(%arg0: i32) -> (i32, i32, i32) {
    %c0_i32 = arith.constant 0 : i32
    %c0_i32_0 = arith.constant 0 : i32
    %c0_i32_1 = arith.constant 0 : i32
    return %arg0, %c0_i32, %c0_i32_0 : i32, i32, i32
  }
}

</mosaic_0001>

<bundles_post_ra>
// kernel: tpu_custom_call.1
= control target key start
LH: loop header
LB: loop body
LE: loop exit
PB: predicated region body
PF: predicated region fallthrough
CT: control target
= control target key end

     0   :  { %s1029_s0 = inlined_call_operand.hbm [shape: f32[2,32,256], index: 0, kind: input, shape index: {}]   ;;  %s1030_s1 = inlined_call_operand.vmem [shape: f32[32,8], index: 1, kind: input, shape index: {}]   ;;  %s1031_s2 = inlined_call_operand.vmem [shape: f32[32,8], index: 2, kind: input, shape index: {}]   ;;  %s1032_s3 = inlined_call_operand.vmem [shape: f32[1,32], index: 3, kind: input, shape index: {}]   ;;  %s1033_s4 = inlined_call_operand.<no memory space> [shape: f32[1,1], index: 4, kind: input, shape index: {}]   ;;  %s1034_s5 = inlined_call_operand.hbm [shape: f32[2,32,256], index: 5, kind: output, shape index: {}]  }
   0x1   :  { %10 = sst [smem:[#allocation2]] %s1033_s4 }
   0x2   :  { %11 = vsyncpa [#allocation4], 0 }
   0x3   :  { %13 = vsyncpa [#allocation4 + $0x1], 0 }
   0x4   :  { %14 = vsyncpa [#allocation5], 0 }
   0x5   :  { %16 = vsyncpa [#allocation5 + $0x1], 0  ;;  %s788_s20 = smov 0   ;;  %s790_s21 = smov 0  }
   0x6   :  { %s792_s22 = smov 0   ;;  %s794_s23 = smov 0  }
   0x7 LB: > { %s809_s4 = sadd.s32 4294967295, %s746_s23   ;;  %s544_s24 = sadd.s32 4294967294, %s746_s23   ;;  %s746_s23 = sphi %s794_s23, %s1047_s23   ;;  %s742_s22 = sphi %s792_s22, %s1046_s22   ;;  %s738_s21 = sphi %s790_s21, %s1045_s21   ;;  %s734_s20 = sphi %s788_s20, %s1044_s20  }
   0x8   : > { %s813_s25 = sadd.s32 1, %s746_s23   ;;  %s29_s26 = sadd.s32 1, %s742_s22 }
   0x9   : > { %s26_s27 = ssub.s32 %s746_s23, %s813_s25  ;;  %p36_p0 = scmp.ne.s32.totalorder %s742_s22, %s738_s21 }
   0xa   : > { %p27_p1 = scmp.eq.s32.totalorder %s26_s27, 0  ;;  %p37_p2 = scmp.eq.s32.totalorder %s746_s23, 0 }
   0xb   : > { %p42_p3 = scmp.ne.s32.totalorder %s738_s21, %s734_s20  ;;  %p43_p4 = scmp.eq.s32.totalorder %s809_s4, 0 }
   0xc   : > { %s825_s28 = scalar_select %p27_p1, %s742_s22, %s29_s26  }
   0xd   : > { %p827_p5 = por %p37_p2, %p36_p0  ;;  %p831_p6 = por %p43_p4, %p42_p3 }
   0xe   : > { %p150_p7 = scmp.eq.s32.totalorder %s809_s4, 1  ;;  %p156_p8 = scmp.eq.s32.totalorder %s544_s24, 1 }
   0xf   : > { %p587_p10 = scmp.lt.s32.totalorder %s746_s23, 2  ;;  %s188_s8 = sand.u32 1, %s742_s22  }
  0x10   : > { %p838_p11 = por %p150_p7, %p36_p0  ;;  %p842_p12 = por %p156_p8, %p42_p3 }
  0x11   : > { %s565_s9 = sshll.u32 %s746_s23, 10  ;;  %s547_s10 = sshll.u32 %s188_s8, 6 }
  0x12   : > { %s1038_s6 = scalar_select %p838_p11, 1, 0 }
  0x13   : > { %s1039_s7 = scalar_select %p842_p12, 1, 0 }
  0x14   : > { %s851_s13 = scalar_lea.hbm %s1029_s0, %s565_s9  ;;  %s192_s14 = scalar_lea.vmem [#allocation3], %s547_s10 }
  0x15   : > { %s199_s15 = sshll.u32 %s192_s14, 4  ;;  %p855_p13 = pnand %p587_p10, %p827_p5  ;;  %s859_s15 = int_to_ptr.vmem [resolvable:$true] %s199_s15 }
  0x16   : > { %s861_s17 = scalar_lea.sflag [#allocation4], %s188_s8  ;;  %s650_s18 = scalar_lea.hbm %s851_s13, 1024 }
  0x17   : > { %p651_p0 = scmp.ne.s32.totalorder %s851_s13, %s650_s18  ;;  %p652_p1 = pneg %p855_p13 }
  0x18   : > { %s655_s26 = scalar_lea.hbm %s1029_s0, 2048  ;;  %p656_p4 = scmp.lt.u32.totalorder %s851_s13, %s1029_s0 }
  0x19   : > { %p653_p2 = pnand %p652_p1, %p651_p0  ;;  %p657_p5 = scmp.lt.u32.totalorder %s655_s26, %s650_s18 }
  0x1a   : > { %p659_p8 = scmp.lt.u32.totalorder %s650_s18, %s851_s13 }
  0x1b   : > { %p654_p3 = pneg %p653_p2  ;;  %p658_p7 = por %p657_p5, %p656_p4 }
  0x1d   : > { %p660_p10 = por %p659_p8, %p658_p7 }
  0x1f   : > { %p661_p9 = pnand %p660_p10, %p654_p3 }
  0x21   : > { %664 = shalt.err (!%p661_p9)
}
  0x22   : > { %s665_s8 = scalar_lea.vmem %s859_s15, 1024  ;;  %s748_s9 = smov [#allocation3]  }
  0x23   : > { %p666_p0 = scmp.ne.s32.totalorder %s859_s15, %s665_s8  ;;  %s670_s10 = sshll.u32 %s748_s9, 4  ;;  %s671_s10 = int_to_ptr.vmem [resolvable:$false] %s670_s10 }
  0x24   : > { %s672_s11 = scalar_lea.vmem %s671_s10, 2048  ;;  %p673_p11 = scmp.lt.s32.totalorder %s859_s15, %s671_s10 }
  0x25   : > { %p668_p2 = pnand %p666_p0, %p652_p1  ;;  %p674_p4 = scmp.lt.s32.totalorder %s672_s11, %s665_s8 }
  0x27   : > { %p669_p12 = pneg %p668_p2  ;;  %p675_p5 = por %p674_p4, %p673_p11 }
  0x29   : > { %p676_p7 = pnand %p675_p5, %p669_p12 }
  0x2b   : > { %679 = shalt.err (!%p676_p7)
}
  0x2c   : > { %s749_s12 = smov 256   ;;  %s750_s14 = smov 16  }
  0x2d   : > { %582 = dma.hbm_to_vmem [thread:$0]  (!%p855_p13), %s851_s13, 1024, %s859_s15, %s861_s17, %s749_s12, %s749_s12, %s750_s14  }
  0x2e   : > { %p550_p9 = scmp.ge.s32.totalorder %s746_s23, 1  ;;  %p207_p1 = scmp.lt.s32.totalorder %s746_s23, 3 }
  0x30   : > { %p208_p3 = pnand %p550_p9, %p207_p1 }
  0x31   : > { %s892_s18 = sand.u32 (!%p208_p3), 1, %s738_s21  }
  0x32   : > { %211 = sbr.rel (%p208_p3) target bundleno = 427 (0x1ab), region = 40  ;;  %s551_s19 = sshll.u32 (!%p208_p3), %s892_s18, 6 }
  0x33   : > { %s214_s24 = scalar_lea.sflag (!%p208_p3), [#allocation4], %s892_s18  ;;  %s217_s26 = scalar_lea.vmem (!%p208_p3), [#allocation3], %s551_s19 }
  0x39   : > { %725 = dma.done.wait (%p831_p6), %s214_s24, 1024  }
  0x3a   : > { %727 = vsyncadd (%p831_p6), %s214_s24, 4294966272  ;;  %v751_v0 = vmov 0.0   ;;  %v902_v1 = vld [vmem:[%s217_s26] sm:$0xff]  ;;  %v904_v2 = vld [vmem:[%s217_s26 + $0x8] sm:$0xff]  ;;  %vm338_vm0 = vcmask 261120   ;;  %vm276_vm1 = vcmask 64512  }
  0x3b   : > { %406 = vmatprep.mubr.f32.mxu0 %v751_v0  ;;  %v906_v3 = vld [vmem:[%s217_s26 + $0x20] sm:$0xff]  ;;  %v252_v4 = vadd.f32 %v904_v2, %v902_v1  ;;  %v910_v5 = vld [vmem:[%s217_s26 + $0x28] sm:$0xff]  ;;  %v912_v6 = vld [vmem:[%s217_s26 + $0x10] sm:$0xff]  ;;  %s336_s16 = sld [smem:[#allocation2]]  ;;  %s566_s17 = sshll.u32 %s809_s4, 10 }
  0x3c   : > { %v914_v7 = vld [vmem:[%s217_s26 + $0x18] sm:$0xff]  ;;  %v258_v8 = vadd.f32 %v910_v5, %v906_v3  ;;  %v918_v9 = vld [vmem:[%s217_s26 + $0x30] sm:$0xff]  ;;  %v569_v12 = vpack.c.bf16 %v912_v6, %v902_v1  ;;  %v335_v17 = vld [vmem:[%s1032_s3] sm:$0x1]  ;;  %s243_s27 = scalar_lea.vmem [#allocation6], %s551_s19  ;;  %s981_s19 = scalar_lea.hbm %s1034_s5, %s566_s17 }
  0x3d   : > { %v920_v10 = vld [vmem:[%s217_s26 + $0x38] sm:$0xff]  ;;  %v567_v11 = vpack.c.bf16 %v914_v7, %v904_v2  ;;  %253 = vadd.xlane.f32.xlu0 %v252_v4  ;;  %v255_v13 = vadd.f32 %v914_v7, %v912_v6  ;;  %v573_v16 = vpack.c.bf16 %v918_v9, %v906_v3  ;;  %v268_v21 = vld [vmem:[%s1030_s1] sm:$0xff]  ;;  %v270_v23 = vld [vmem:[%s1030_s1 + $0x10] sm:$0xff]  ;;  %s471_s29 = sshll.u32 %s243_s27, 4  ;;  %s458_s9 = scalar_lea.sflag [#allocation5], %s892_s18  ;;  %s983_s29 = int_to_ptr.vmem [resolvable:$true] %s471_s29 }
  0x3e   : > { %v571_v14 = vpack.c.bf16 %v920_v10, %v910_v5  ;;  %259 = vadd.xlane.f32.xlu1 %v258_v8  ;;  %v261_v15 = vadd.f32 %v920_v10, %v918_v9  ;;  %v269_v24 = vld [vmem:[%s1030_s1 + $0x8] sm:$0xff]  ;;  %v271_v28 = vld [vmem:[%s1030_s1 + $0x18] sm:$0xff]  ;;  %v291_v48 = vld [vmem:[%s1031_s2] sm:$0xff]  ;;  %s680_s10 = scalar_lea.vmem %s983_s29, 1024  ;;  %p1041_p11 = scmp.ne.s32.totalorder %s1038_s6, 0 }
  0x3f   : > { %568 = vmatprep.subr.bf16.mxu0 %v567_v11  ;;  %v292_v47 = vld [vmem:[%s1031_s2 + $0x8] sm:$0xff]  ;;  %v294_v50 = vld [vmem:[%s1031_s2 + $0x18] sm:$0xff]  ;;  %v293_v51 = vld [vmem:[%s1031_s2 + $0x10] sm:$0xff]  ;;  %p681_p6 = scmp.ne.s32.totalorder %s983_s29, %s680_s10  ;;  %s752_s11 = smov [#allocation6]  }
  0x40   : > { %570 = vmatpush1.bf16.msra.mxu0 %v569_v12  ;;  %s684_s12 = sshll.u32 %s752_s11, 4  ;;  %s685_s12 = int_to_ptr.vmem [resolvable:$false] %s684_s12 }
  0x41   : > { %572 = vmatprep.subr.bf16.mxu0 %v571_v14  ;;  %256 = vadd.xlane.f32.xlu0 %v255_v13  ;;  %v337_v62 = vstv %s336_s16  ;;  %p682_p12 = pnand %p681_p6, %p1041_p11  ;;  %s686_s14 = scalar_lea.vmem %s685_s12, 2048 }
  0x42   : > { %262 = vadd.xlane.f32.xlu1 %v261_v15  ;;  %p687_p8 = scmp.lt.s32.totalorder %s983_s29, %s685_s12  ;;  %p688_p10 = scmp.lt.s32.totalorder %s686_s14, %s680_s10 }
  0x43   : > { %p683_p13 = pneg %p682_p12 }
  0x44   : > { %574 = vmatpush1.bf16.msra.mxu0 %v573_v16  ;;  %p689_p0 = por %p688_p10, %p687_p8 }
  0x46   : > { %p690_p2 = pnand %p689_p0, %p683_p13 }
  0x47   : > { %557 = vmatmul.mubr.msk.f32.vlgmr.msra.gmra.mrb[0].mxu0 %vm338_vm0, %v335_v17 }
  0xca   : > { %v254_v18 = vpop.xlane.xlu0 %253 }
  0xcb   : > { %v264_v19 = vmul.f32 0.00390625, %v254_v18  ;;  %v260_v20 = vpop.xlane.xlu1 %259 }
  0xcc   : > { %v266_v22 = vmul.f32 0.00390625, %v260_v20 }
  0xcd   : > { %v272_v26 = vmul.f32 %v268_v21, %v264_v19 }
  0xce   : > { %v257_v25 = vpop.xlane.xlu0 %256  ;;  %v274_v31 = vmul.f32 %v270_v23, %v266_v22  ;;  %v425_v23 = vlaneseq }
  0xcf   : > { %v265_v27 = vmul.f32 0.00390625, %v257_v25  ;;  %v263_v29 = vpop.xlane.xlu1 %262  ;;  %v277_v34 = vsel %vm276_vm1, %v272_v26, 0.0 }
  0xd0   : > { %v267_v30 = vmul.f32 0.00390625, %v263_v29  ;;  %v280_v37 = vsel %vm276_vm1, %v274_v31, 0.0 }
  0xd1   : > { %v273_v32 = vmul.f32 %v269_v24, %v265_v27  ;;  %v426_v27 = vshrl.u32 %v425_v23, 7 }
  0xd2   : > { %v275_v33 = vmul.f32 %v271_v28, %v267_v30 }
  0xd3   : > { %v278_v35 = vsel %vm276_vm1, %v273_v32, 0.0 }
  0xd4   : > { %v279_v36 = vadd.f32 %v278_v35, %v277_v34  ;;  %v282_v38 = vsel %vm276_vm1, %v275_v33, 0.0  ;;  %v427_v33 = vsub.s32 0, %v426_v27 }
  0xd6   : > { %v281_v39 = vadd.f32 %v280_v37, %v279_v36 }
  0xd8   : > { %v283_v40 = vadd.f32 %v282_v38, %v281_v39 }
  0xda   : > { %v284_v41 = vrot.slane %v283_v40, 4 }
  0xdc   : > { %v285_v42 = vadd.f32 %v284_v41, %v283_v40 }
  0xde   : > { %v286_v43 = vrot.slane %v285_v42, 2 }
  0xe0   : > { %v287_v44 = vadd.f32 %v286_v43, %v285_v42 }
  0xe2   : > { %v288_v45 = vrot.slane %v287_v44, 1 }
  0xe4   : > { %v289_v46 = vadd.f32 %v288_v45, %v287_v44 }
  0xe6   : > { %v290_v49 = vmax.f32 %v289_v46, 0.0 }
  0xe8   : > { %v296_v52 = vmul.f32 %v292_v47, %v290_v49  ;;  %v295_v53 = vmul.f32 %v291_v48, %v290_v49  ;;  %v298_v56 = vmul.f32 %v294_v50, %v290_v49  ;;  %v297_v57 = vmul.f32 %v293_v51, %v290_v49 }
  0xea   : > { %v302_v54 = vsel %vm276_vm1, %v296_v52, 0.0  ;;  %v299_v55 = vsel %vm276_vm1, %v295_v53, 0.0  ;;  %v308_v58 = vsel %vm276_vm1, %v298_v56, 0.0  ;;  %v305_v59 = vsel %vm276_vm1, %v297_v57, 0.0 }
  0xeb   : > { %303 = vadd.xlane.f32.xlu1 %v302_v54  ;;  %300 = vadd.xlane.f32.xlu0 %v299_v55 }
  0xef   : > { %309 = vadd.xlane.f32.xlu1 %v308_v58  ;;  %306 = vadd.xlane.f32.xlu0 %v305_v59 }
 0x11a   : > { %v408_v60 = vpop.f32.mrb[0].mxu0 }
 0x11b   : > { %v410_v61 = vpop.f32.mrb[1].mxu0  ;;  %v409_v63 = vadd.f32 %v408_v60, %v337_v62 }
 0x11c   : > { %v411_v0 = vadd.f32 %v410_v61, %v337_v62 }
 0x11d   : > { %v558_v4 = vmul.f32 -1.442695, %v409_v63 }
 0x11e   : > { %v559_v8 = vmul.f32 -1.442695, %v411_v0 }
 0x11f   : > { %626 = vpow2.f32 %v558_v4 }
 0x120   : > { %628 = vpow2.f32 %v559_v8 }
 0x129   : > { %v627_v15 = vpop.eup %626 }
 0x12a   : > { %v629_v16 = vpop.eup %628  ;;  %v419_v19 = vadd.f32 1.0, %v627_v15 }
 0x12b   : > { %v420_v22 = vadd.f32 1.0, %v629_v16 }
 0x178   : > { %v304_v11 = vpop.xlane.xlu1 %303  ;;  %v301_v12 = vpop.xlane.xlu0 %300 }
 0x179   : > { %v554_v13 = vmul.f32 -1.442695, %v304_v11  ;;  %v553_v14 = vmul.f32 -1.442695, %v301_v12 }
 0x17b   : > { %630 = vpow2.f32 %v554_v13 }
 0x17c   : > { %632 = vpow2.f32 %v553_v14  ;;  %v310_v17 = vpop.xlane.xlu1 %309  ;;  %v307_v18 = vpop.xlane.xlu0 %306 }
 0x17d   : > { %v556_v20 = vmul.f32 -1.442695, %v310_v17  ;;  %v555_v21 = vmul.f32 -1.442695, %v307_v18 }
 0x17f   : > { %634 = vpow2.f32 %v556_v20 }
 0x180   : > { %636 = vpow2.f32 %v555_v21 }
 0x181   : > { %638 = vrcp.f32 %v419_v19 }
 0x182   : > { %640 = vrcp.f32 %v420_v22 }
 0x185   : > { %v631_v24 = vpop.eup %630 }
 0x186   : > { %v633_v25 = vpop.eup %632  ;;  %v324_v26 = vadd.f32 1.0, %v631_v24 }
 0x187   : > { %v323_v28 = vadd.f32 1.0, %v633_v25 }
 0x188   : > { %642 = vrcp.f32 %v324_v26 }
 0x189   : > { %v635_v29 = vpop.eup %634  ;;  %644 = vrcp.f32 %v323_v28 }
 0x18a   : > { %v637_v30 = vpop.eup %636  ;;  %v326_v31 = vadd.f32 1.0, %v635_v29 }
 0x18b   : > { %v639_v32 = vpop.eup %638  ;;  %v325_v34 = vadd.f32 1.0, %v637_v30 }
 0x18c   : > { %v641_v35 = vpop.eup %640  ;;  %646 = vrcp.f32 %v326_v31  ;;  %v428_v36 = vrot.slane %v639_v32, %v427_v33 }
 0x18d   : > { %648 = vrcp.f32 %v325_v34  ;;  %v432_v37 = vrot.slane %v641_v35, %v427_v33 }
 0x192   : > { %v643_v38 = vpop.eup %642 }
 0x193   : > { %v645_v39 = vpop.eup %644  ;;  %v435_v40 = vadd.f32 %v643_v38, %v428_v36  ;;  %v436_v41 = vadd.f32 %v643_v38, %v432_v37 }
 0x194   : > { %v433_v42 = vadd.f32 %v645_v39, %v428_v36  ;;  %v434_v43 = vadd.f32 %v645_v39, %v432_v37 }
 0x195   : > { %v443_v44 = vmul.f32 %v435_v40, %v912_v6  ;;  %v444_v45 = vmul.f32 %v436_v41, %v914_v7 }
 0x196   : > { %v647_v46 = vpop.eup %646  ;;  %v441_v47 = vmul.f32 %v433_v42, %v902_v1  ;;  %v442_v48 = vmul.f32 %v434_v43, %v904_v2 }
 0x197   : > { %v649_v49 = vpop.eup %648  ;;  %451 = vst [vmem:[%s243_s27 + $0x10] sm:$0xff] %v443_v44  ;;  %452 = vst [vmem:[%s243_s27 + $0x18] sm:$0xff] %v444_v45  ;;  %v439_v50 = vadd.f32 %v647_v46, %v428_v36  ;;  %v440_v51 = vadd.f32 %v647_v46, %v432_v37 }
 0x198   : > { %449 = vst [vmem:[%s243_s27] sm:$0xff] %v441_v47  ;;  %450 = vst [vmem:[%s243_s27 + $0x8] sm:$0xff] %v442_v48  ;;  %v437_v6 = vadd.f32 %v649_v49, %v428_v36  ;;  %v438_v7 = vadd.f32 %v649_v49, %v432_v37 }
 0x199   : > { %v447_v52 = vmul.f32 %v439_v50, %v918_v9  ;;  %v448_v1 = vmul.f32 %v440_v51, %v920_v10 }
 0x19a   : > { %v445_v2 = vmul.f32 %v437_v6, %v906_v3  ;;  %v446_v53 = vmul.f32 %v438_v7, %v910_v5 }
 0x19b   : > { %455 = vst [vmem:[%s243_s27 + $0x30] sm:$0xff] %v447_v52  ;;  %456 = vst [vmem:[%s243_s27 + $0x38] sm:$0xff] %v448_v1 }
 0x19c   : > { %453 = vst [vmem:[%s243_s27 + $0x20] sm:$0xff] %v445_v2  ;;  %454 = vst [vmem:[%s243_s27 + $0x28] sm:$0xff] %v446_v53 }
 0x19d   : > { %693 = shalt.err (!%p690_p2)
}
 0x19e   : > { %s694_s24 = scalar_lea.hbm %s981_s19, 1024  ;;  %s698_s13 = scalar_lea.hbm %s1034_s5, 2048 }
 0x19f   : > { %p695_p4 = scmp.ne.s32.totalorder %s981_s19, %s694_s24  ;;  %p699_p9 = scmp.lt.u32.totalorder %s981_s19, %s1034_s5 }
 0x1a0   : > { %p700_p1 = scmp.lt.u32.totalorder %s698_s13, %s694_s24  ;;  %p702_p6 = scmp.lt.u32.totalorder %s694_s24, %s981_s19 }
 0x1a1   : > { %p696_p5 = pnand %p695_p4, %p1041_p11 }
 0x1a2   : > { %p701_p3 = por %p700_p1, %p699_p9 }
 0x1a3   : > { %p697_p7 = pneg %p696_p5 }
 0x1a4   : > { %p703_p12 = por %p702_p6, %p701_p3 }
 0x1a6   : > { %p704_p13 = pnand %p703_p12, %p697_p7 }
 0x1a8   : > { %707 = shalt.err (!%p704_p13)
}
 0x1a9   : > { %s753_s17 = smov 256   ;;  %s754_s27 = smov 16  }
 0x1aa   : > { %577 = dma.vmem_to_hbm [thread:$0]  (%p1041_p11), %s983_s29, 1024, %s981_s19, %s458_s9, %s753_s17, %s753_s17, %s754_s27  }
 0x1ab PF: > { %s486_s8 = sand.u32 1, %s734_s20   ;;  %p1042_p8 = scmp.ne.s32.totalorder %s1039_s7, 0 }
 0x1ac   : > { %p1043_p10 = scmp.ge.s32.totalorder %s746_s23, 2  ;;  %s487_s4 = scalar_lea.sflag [#allocation5], %s486_s8 }
 0x1ae   : > { %p584_p0 = pnand %p1043_p10, %p1042_p8 }
 0x1b0   : > { %729 = dma.done.wait (!%p584_p0), %s487_s4, 1024  }
 0x1b1   : > { %731 = vsyncadd (!%p584_p0), %s487_s4, 4294966272  ;;  %p19_p2 = scmp.ge.s32.totalorder %s813_s25, 4   ;;  %s1044_s20 = smov %s738_s21 }
 0x1b2   : > { %s1045_s21 = smov %s742_s22  ;;  %s1046_s22 = smov %s825_s28 }
 0x1b3   : > { %s1047_s23 = smov %s813_s25  ;;  %21 = sbr.rel (!%p19_p2) target bundleno = 7 (0x7), region = 85 }
 0x1ba   :  { %492 = vsyncpa [#allocation4], 1 }
 0x1bb   :  { %494 = vsyncpa [#allocation4 + $0x1], 1 }
 0x1bc   :  { %495 = vsyncpa [#allocation5], 1 }
 0x1bd   :  { %497 = vsyncpa [#allocation5 + $0x1], 1 }

</bundles_post_ra>
